<compile_context>
chip_gen: v7x
topology: tpu7x:2x2x1
jax: 0.10.0
libtpu: 0.0.40
codegen_flags: <defaults>
</compile_context>

<pallas_src>
import numpy as np
import jax
import jax.numpy as jnp
from jax.experimental import pallas as pl
from jax.experimental.pallas import tpu as pltpu

KSIZE = 13                      # size of the blur kernel (k.shape[0])
PAD = KSIZE // 2                # ReflectionPad2d(size // 2)


def make_blur_weights(size: int = KSIZE, sigma: float = 2.0) -> np.ndarray:
    """Deterministic stand-in for np.load('blur_kernel.npy').squeeze()."""
    ax = np.arange(size, dtype=np.float32) - (size - 1) / 2.0
    g = np.exp(-(ax ** 2) / (2.0 * sigma ** 2))
    k2d = np.outer(g, g)
    k2d = k2d / k2d.sum()
    return k2d.astype(np.float32)


# ---------------------------------------------------------------------------
# Host-side precompute: fold (reflection pad + separable conv taps) into
# per-rank banded matrices  Av (R,H,H) and AhT (R,W,W).
# ---------------------------------------------------------------------------
def _conv_matrices(k2d: np.ndarray, H: int, W: int):
    k64 = np.asarray(k2d, dtype=np.float64)
    K = k64.shape[0]
    pad = K // 2
    # jnp.pad 'reflect' / ReflectionPad2d require at least pad+1 rows/cols.
    assert H >= pad + 1 and W >= pad + 1, "image too small for reflection pad"

    U, S, Vt = np.linalg.svd(k64)
    keep = S >= (S[0] * 1e-6 if S[0] > 0 else np.inf)
    ranks = np.nonzero(keep)[0]          # rank-1 for a Gaussian kernel

    def band(n: int, taps: np.ndarray) -> np.ndarray:
        # B[i, i+t] = taps[t]  (cross-correlation, i.e. Conv2d: no flip)
        B = np.zeros((n, n + 2 * pad), np.float64)
        idx = np.arange(n)
        for t in range(taps.shape[0]):
            B[idx, idx + t] = taps[t]
        return B

    def reflect(n: int) -> np.ndarray:
        # R[p, src(p)] = 1 : padded index p -> source index (reflect, no edge repeat)
        R = np.zeros((n + 2 * pad, n), np.float64)
        for p in range(n + 2 * pad):
            j = p - pad
            if j < 0:
                j = -j
            elif j >= n:
                j = 2 * (n - 1) - j
            R[p, j] = 1.0
        return R

    Rv, Rh = reflect(H), reflect(W)
    Av_list, AhT_list = [], []
    for r in ranks:
        gv = U[:, r] * np.sqrt(S[r])     # vertical taps (kh)
        gh = Vt[r, :] * np.sqrt(S[r])    # horizontal taps (kw)
        Av = band(H, gv) @ Rv            # (H, H) : vertical taps + reflect pad
        Ah = band(W, gh) @ Rh            # (W, W) : horizontal taps + reflect pad
        Av_list.append(Av)
        AhT_list.append(Ah.T)
    return (np.stack(Av_list).astype(np.float32),     # (R, H, H)
            np.stack(AhT_list).astype(np.float32))    # (R, W, W)


def _pick_tile_h(H: int) -> int:
    """Largest H-strip (<=256, multiple of 8) that divides H; full H if small."""
    if H <= 256:
        return H
    for t in range(256, 7, -1):
        if H % t == 0 and t % 8 == 0:
            return t
    return H


# ---------------------------------------------------------------------------
# Pallas kernel: one batch element x one output row-strip per grid step.
# ---------------------------------------------------------------------------
def _blur_matmul_kernel(av_ref, x_ref, aht_ref, out_ref):
    # av_ref:  (R, TILE_H, H)  banded vertical matrices (rows for this strip)
    # x_ref:   (1, H, W)       unpadded input image
    # aht_ref: (R, W, W)       banded horizontal matrices, pre-transposed
    # out_ref: (1, TILE_H, W)
    x = x_ref[0]                                           # (H, W)
    acc = jnp.zeros(out_ref.shape[1:], jnp.float32)
    for r in range(av_ref.shape[0]):                       # static unroll over rank
        t = jnp.dot(av_ref[r, :, :], x,
                    preferred_element_type=jnp.float32)    # MXU: (TILE_H, W)
        acc = acc + jnp.dot(t, aht_ref[r, :, :],
                            preferred_element_type=jnp.float32)  # MXU: (TILE_H, W)
    out_ref[0] = acc.astype(out_ref.dtype)


def blur_layer(x: jax.Array, weights: jax.Array) -> jax.Array:
    """x: (N, 1, H, W) float32, weights: (KSIZE, KSIZE) float32 -> (N, 1, H, W)."""
    N, C, H, W = x.shape
    assert C == 1, "BlurLayer uses Conv2d(1, 1, ...)"

    Av_np, AhT_np = _conv_matrices(np.asarray(weights), H, W)
    Av, AhT = jnp.asarray(Av_np), jnp.asarray(AhT_np)
    R = Av.shape[0]

    TILE_H = _pick_tile_h(H)
    grid = (N, H // TILE_H)
    # TODO(synk): for very large images (H*W*4 or H*H*4 approaching the VMEM
    # budget, esp. v7x 64 MiB) switch to halo-strip tiling of x and of the Av
    # band instead of keeping the full image height resident per step.

    out = pl.pallas_call(
        _blur_matmul_kernel,
        out_shape=jax.ShapeDtypeStruct((N, H, W), x.dtype),
        grid_spec=pltpu.PrefetchScalarGridSpec(
            num_scalar_prefetch=0,
            grid=grid,
            in_specs=[
                pl.BlockSpec((R, TILE_H, H), lambda b, i: (0, i, 0)),  # Av strip
                pl.BlockSpec((1, H, W), lambda b, i: (b, 0, 0)),       # image
                pl.BlockSpec((R, W, W), lambda b, i: (0, 0, 0)),       # AhT (full)
            ],
            out_specs=pl.BlockSpec((1, TILE_H, W), lambda b, i: (b, i, 0)),
        ),
        compiler_params=pltpu.CompilerParams(
            dimension_semantics=("parallel", "parallel")),
    )(Av, x[:, 0, :, :], AhT)

    return out[:, None, :, :]                               # (N, 1, H, W)


def _reference(x: jax.Array, weights: jax.Array) -> jax.Array:
    """Plain-JAX reference: reflection pad + valid cross-correlation."""
    xpad = jnp.pad(x, ((0, 0), (0, 0), (PAD, PAD), (PAD, PAD)), mode="reflect")
    w = weights[None, None, :, :]                            # OIHW (1,1,k,k)
    return jax.lax.conv_general_dilated(
        xpad, w, window_strides=(1, 1), padding="VALID",
        dimension_numbers=("NCHW", "OIHW", "NCHW"))


if __name__ == "__main__":
    key = jax.random.PRNGKey(0)
    # 128x128 keeps the example small while giving MXU-native, lane-dense tiles.
    N, C, H, W = 2, 1, 128, 128
    x = jax.random.normal(key, (N, C, H, W), dtype=jnp.float32)
    weights = jnp.asarray(make_blur_weights())

    y = jax.block_until_ready(blur_layer(x, weights))
    y_ref = jax.block_until_ready(_reference(x, weights))
    np.testing.assert_allclose(np.asarray(y), np.asarray(y_ref),
                               rtol=1e-4, atol=2e-5)

    print("KERNEL_OK")
</pallas_src>

<mosaic_0001>
module attributes {stable_mosaic.version = 11 : i64} {
  func.func @_blur_matmul_kernel(%arg0: i32, %arg1: i32, %arg2: memref<1x128x128xf32, #tpu.memory_space<vmem>>, %arg3: memref<1x128x128xf32, #tpu.memory_space<vmem>>, %arg4: memref<1x128x128xf32, #tpu.memory_space<vmem>>, %arg5: memref<1x128x128xf32, #tpu.memory_space<vmem>>) attributes {dimension_semantics = [#tpu.dimension_semantics<parallel>, #tpu.dimension_semantics<parallel>], iteration_bounds = array<i64: 2, 1>, scalar_prefetch = 0 : i64, scratch_operands = 0 : i64, tpu.core_type = #tpu.core_type<tc>, window_params = [{transform_indices = @transform_0, window_bounds = array<i64: 1, 128, 128>}, {transform_indices = @transform_1, window_bounds = array<i64: 1, 128, 128>}, {pipeline_mode = #tpu.pipeline_mode<synchronous>, transform_indices = @transform_2, window_bounds = array<i64: 1, 128, 128>}, {transform_indices = @transform_3, window_bounds = array<i64: 1, 128, 128>}]} {
    %c0 = arith.constant 0 : index
    %c0_0 = arith.constant 0 : index
    %c0_1 = arith.constant 0 : index
    %0 = vector.load %arg3[%c0, %c0_0, %c0_1] : memref<1x128x128xf32, #tpu.memory_space<vmem>>, vector<1x128x128xf32>
    %1 = vector.shape_cast %0 : vector<1x128x128xf32> to vector<128x128xf32>
    %cst = arith.constant 0.000000e+00 : f32
    %2 = vector.broadcast %cst : f32 to vector<128x128xf32>
    %c0_2 = arith.constant 0 : index
    %c0_3 = arith.constant 0 : index
    %c0_4 = arith.constant 0 : index
    %3 = vector.load %arg2[%c0_2, %c0_3, %c0_4] : memref<1x128x128xf32, #tpu.memory_space<vmem>>, vector<1x128x128xf32>
    %4 = vector.shape_cast %3 : vector<1x128x128xf32> to vector<128x128xf32>
    %cst_5 = arith.constant dense<0.000000e+00> : vector<128x128xf32>
    %5 = tpu.matmul %4, %1, %cst_5 {dimension_numbers = #tpu.dot_dimension_numbers<[1], [0], [0], [1], [0, 0, 1, 1], [], []>} : vector<128x128xf32>, vector<128x128xf32>, vector<128x128xf32> -> vector<128x128xf32>
    %c0_6 = arith.constant 0 : index
    %c0_7 = arith.constant 0 : index
    %c0_8 = arith.constant 0 : index
    %6 = vector.load %arg4[%c0_6, %c0_7, %c0_8] : memref<1x128x128xf32, #tpu.memory_space<vmem>>, vector<1x128x128xf32>
    %7 = vector.shape_cast %6 : vector<1x128x128xf32> to vector<128x128xf32>
    %cst_9 = arith.constant dense<0.000000e+00> : vector<128x128xf32>
    %8 = tpu.matmul %5, %7, %cst_9 {dimension_numbers = #tpu.dot_dimension_numbers<[1], [0], [0], [1], [0, 0, 1, 1], [], []>} : vector<128x128xf32>, vector<128x128xf32>, vector<128x128xf32> -> vector<128x128xf32>
    %9 = arith.addf %2, %8 : vector<128x128xf32>
    %c0_10 = arith.constant 0 : index
    %c0_11 = arith.constant 0 : index
    %c0_12 = arith.constant 0 : index
    %10 = vector.load %arg5[%c0_10, %c0_11, %c0_12] : memref<1x128x128xf32, #tpu.memory_space<vmem>>, vector<1x128x128xf32>
    %11 = vector.shape_cast %10 : vector<1x128x128xf32> to vector<128x128xf32>
    %12 = vector.shape_cast %9 : vector<128x128xf32> to vector<1x128x128xf32>
    tpu.vector_store %arg5[%c0_10, %c0_11, %c0_12], %12 {strides = array<i32>} : memref<1x128x128xf32, #tpu.memory_space<vmem>>, vector<1x128x128xf32>,
    return
  }
  func.func @transform_0(%arg0: i32, %arg1: i32) -> (i32, i32, i32) {
    %c0_i32 = arith.constant 0 : i32
    %c0_i32_0 = arith.constant 0 : i32
    %c0_i32_1 = arith.constant 0 : i32
    return %c0_i32, %arg1, %c0_i32_0 : i32, i32, i32
  }
  func.func @transform_1(%arg0: i32, %arg1: i32) -> (i32, i32, i32) {
    %c0_i32 = arith.constant 0 : i32
    %c0_i32_0 = arith.constant 0 : i32
    %c0_i32_1 = arith.constant 0 : i32
    return %arg0, %c0_i32, %c0_i32_0 : i32, i32, i32
  }
  func.func @transform_2(%arg0: i32, %arg1: i32) -> (i32, i32, i32) {
    %c0_i32 = arith.constant 0 : i32
    %c0_i32_0 = arith.constant 0 : i32
    %c0_i32_1 = arith.constant 0 : i32
    %c0_i32_2 = arith.constant 0 : i32
    return %c0_i32, %c0_i32_0, %c0_i32_1 : i32, i32, i32
  }
  func.func @transform_3(%arg0: i32, %arg1: i32) -> (i32, i32, i32) {
    %c0_i32 = arith.constant 0 : i32
    %c0_i32_0 = arith.constant 0 : i32
    return %arg0, %arg1, %c0_i32 : i32, i32, i32
  }
}

</mosaic_0001>

<bundles_post_ra>
// kernel: tpu_custom_call.1
= control target key start
LH: loop header
LB: loop body
LE: loop exit
PB: predicated region body
PF: predicated region fallthrough
CT: control target
= control target key end

     0   :  { %8 = vsyncpa [#allocation3], 0  ;;  %s1568_s0 = inlined_call_operand.hbm [shape: f32[1,128,128], index: 0, kind: input, shape index: {}]   ;;  %s1569_s1 = inlined_call_operand.hbm [shape: f32[2,128,128], index: 1, kind: input, shape index: {}]   ;;  %s1570_s2 = inlined_call_operand.hbm [shape: f32[1,128,128], index: 2, kind: input, shape index: {}]   ;;  %s1571_s3 = inlined_call_operand.hbm [shape: f32[2,128,128], index: 3, kind: output, shape index: {}]  }
   0x1   :  { %9 = vsyncpa [#allocation6], 0 }
   0x2   :  { %11 = vsyncpa [#allocation6 + $0x1], 0 }
   0x3   :  { %12 = vsyncpa [#allocation4], 0 }
   0x4   :  { %14 = vsyncpa [#allocation4 + $0x1], 0  ;;  %s1273_s12 = smov 0   ;;  %s1275_s13 = smov 0  }
   0x5   :  { %s1277_s14 = smov 0   ;;  %s1279_s15 = smov 0  }
   0x6   :  { %s1281_s16 = smov 0   ;;  %s1283_s17 = smov 0  }
   0x7 LB: > { %s1304_s18 = sadd.s32 4294967295, %s1243_s17   ;;  %s720_s19 = sadd.s32 4294967294, %s1243_s17   ;;  %s1243_s17 = sphi %s1283_s17, %s20_s17   ;;  %s1239_s16 = sphi %s1281_s16, %s1600_s16   ;;  %s1235_s15 = sphi %s1279_s15, %s1599_s15   ;;  %s1231_s14 = sphi %s1277_s14, %s1598_s14   ;;  %s1227_s13 = sphi %s1275_s13, %s1597_s13   ;;  %s1223_s12 = sphi %s1273_s12, %s1596_s12  }
   0x8   : > { %p72_p0 = scmp.ne.s32.totalorder %s1231_s14, %s1227_s13  ;;  %p73_p1 = scmp.eq.s32.totalorder %s1243_s17, 0 }
   0x9   : > { %p78_p2 = scmp.ne.s32.totalorder %s1227_s13, %s1223_s12  ;;  %p1572_p3 = scmp.eq.s32.totalorder %s1304_s18, 0 }
   0xa   : > { %p1313_p4 = por %p73_p1, %p72_p0  ;;  %p125_p5 = scmp.eq.s32.totalorder %s1304_s18, 1 }
   0xb   : > { %p1320_p6 = por %p1572_p3, %p78_p2  ;;  %p131_p7 = scmp.eq.s32.totalorder %s720_s19, 1 }
   0xc   : > { %p1324_p8 = por %p125_p5, %p72_p0  ;;  %p721_p9 = scmp.ge.s32.totalorder %s1243_s17, 1 }
   0xd   : > { %s1579_s21 = scalar_select %p1320_p6, 1, 0 }
   0xe   : > { %s1580_s22 = scalar_select %p1324_p8, 1, 0 }
   0xf   : > { %p1329_p10 = por %p131_p7, %p78_p2  ;;  %p138_p11 = scmp.lt.s32.totalorder %s1243_s17, 3 }
  0x10   : > { %s1245_s25 = smov [#allocation7]   ;;  %p1009_p0 = scmp.lt.s32.totalorder %s1243_s17, 2 }
  0x11   : > { %s1581_s23 = scalar_select %p1329_p10, 1, 0 }
  0x12   : > { %p1334_p12 = pnand %p721_p9, %p138_p11  ;;  %s166_s26 = sshll.u32 %s1245_s25, 4  ;;  %s167_s26 = int_to_ptr.vmem [resolvable:$true] %s166_s26 }
  0x13   : > { %p1350_p2 = pnand %p1009_p0, %p1313_p4  ;;  %s1067_s4 = scalar_lea.hbm %s1570_s2, 2048 }
  0x14   : > { %s1582_s24 = scalar_select %p1334_p12, 1, 0 }
  0x15   : > { %p992_p1 = pneg %p1334_p12  ;;  %p1068_p7 = scmp.ne.s32.totalorder %s1570_s2, %s1067_s4 }
  0x16   : > { %s1584_s28 = scalar_select %p1350_p2, 1, 0 }
  0x17   : > { %p1344_p5 = pnand %p992_p1, %p1572_p3  ;;  %p1074_p4 = scmp.lt.u32.totalorder %s1067_s4, %s1570_s2 }
  0x19   : > { %p1069_p9 = pneg %p1344_p5 }
  0x1b   : > { %p1070_p11 = pnand %p1069_p9, %p1068_p7 }
  0x1d   : > { %p1071_p1 = pneg %p1070_p11 }
  0x1f   : > { %p1076_p0 = pnand %p1074_p4, %p1071_p1 }
  0x21   : > { %1079 = shalt.err (!%p1076_p0)
}
  0x22   : > { %s1080_s9 = scalar_lea.vmem %s167_s26, 2048  ;;  %p1088_p8 = scmp.lt.s32.totalorder %s167_s26, %s167_s26 }
  0x23   : > { %p1081_p13 = scmp.ne.s32.totalorder %s167_s26, %s1080_s9  ;;  %p1089_p6 = scmp.lt.s32.totalorder %s1080_s9, %s1080_s9 }
  0x25   : > { %p1083_p3 = pnand %p1081_p13, %p1069_p9  ;;  %p1090_p12 = por %p1089_p6, %p1088_p8 }
  0x27   : > { %p1084_p10 = pneg %p1083_p3 }
  0x29   : > { %p1091_p2 = pnand %p1090_p12, %p1084_p10 }
  0x2b   : > { %1094 = shalt.err (!%p1091_p2)
}
  0x2c   : > { %s1577_s10 = smov 128   ;;  %s1247_s11 = smov 8  }
  0x2d   : > { %998 = dma.hbm_to_vmem [thread:$0]  (!%p1344_p5), %s1570_s2, 2048, %s167_s26, [#allocation6], %s1577_s10, %s1577_s10, %s1247_s11  }
  0x2e   : > { %s1248_s25 = smov [#allocation2]   ;;  %s1095_s5 = scalar_lea.hbm %s1568_s0, 2048 }
  0x2f   : > { %s153_s29 = sshll.u32 %s1248_s25, 4  ;;  %p1096_p3 = scmp.ne.s32.totalorder %s1568_s0, %s1095_s5  ;;  %s154_s29 = int_to_ptr.vmem [resolvable:$true] %s153_s29 }
  0x30   : > { %p1102_p10 = scmp.lt.u32.totalorder %s1095_s5, %s1568_s0 }
  0x31   : > { %p1098_p6 = pnand %p1096_p3, %p1069_p9 }
  0x33   : > { %p1099_p8 = pneg %p1098_p6 }
  0x35   : > { %p1104_p12 = pnand %p1102_p10, %p1099_p8 }
  0x37   : > { %1107 = shalt.err (!%p1104_p12)
}
  0x38   : > { %s1108_s26 = scalar_lea.vmem %s154_s29, 2048  ;;  %p1116_p11 = scmp.lt.s32.totalorder %s154_s29, %s154_s29 }
  0x39   : > { %p1109_p13 = scmp.ne.s32.totalorder %s154_s29, %s1108_s26  ;;  %p1117_p1 = scmp.lt.s32.totalorder %s1108_s26, %s1108_s26 }
  0x3b   : > { %p1111_p2 = pnand %p1109_p13, %p1069_p9  ;;  %p1118_p4 = por %p1117_p1, %p1116_p11 }
  0x3d   : > { %p1112_p7 = pneg %p1111_p2 }
  0x3f   : > { %p1119_p0 = pnand %p1118_p4, %p1112_p7 }
  0x41   : > { %1122 = shalt.err (!%p1119_p0)
}
  0x42   : > { %995 = dma.hbm_to_vmem [thread:$0]  (!%p1344_p5), %s1568_s0, 2048, %s154_s29, [#allocation3], %s1577_s10, %s1577_s10, %s1247_s11  }
  0x43   : > { %s65_s25 = sadd.s32 1, %s1231_s14  ;;  %s32_s30 = sadd.s32 1, %s1239_s16 }
  0x44   : > { %s180_s4 = sand.u32 1, %s1243_s17   ;;  %p34_p9 = scmp.ge.s32.totalorder %s32_s30, 2 }
  0x45   : > { %s182_s27 = sand.u32 1, %s1231_s14   ;;  %s738_s5 = sshll.u32 %s1239_s16, 11 }
  0x46   : > { %s1602_s30 = smov (%p34_p9, %s32_s30), 0  ;;  %s725_s6 = sshll.u32 %s182_s27, 7 }
  0x47   : > { %s1412_s9 = scalar_lea.hbm %s1569_s1, %s738_s5  ;;  %s62_s29 = ssub.s32 %s1239_s16, %s1602_s30 }
  0x48   : > { %p63_p5 = scmp.eq.s32.totalorder %s62_s29, 0  ;;  %s184_s26 = scalar_lea.vmem [#allocation5], %s725_s6 }
  0x49   : > { %s191_s19 = sshll.u32 %s184_s26, 4  ;;  %s1421_s10 = scalar_lea.sflag [#allocation6], %s180_s4  ;;  %s1416_s19 = int_to_ptr.vmem [resolvable:$true] %s191_s19 }
  0x4a   : > { %s1419_s20 = scalar_select %p63_p5, %s1231_s14, %s65_s25  }
  0x4b   : > { %s1123_s27 = scalar_lea.hbm %s1412_s9, 2048  ;;  %p1585_p6 = scmp.ne.s32.totalorder %s1584_s28, 0 }
  0x4c   : > { %p1124_p3 = scmp.ne.s32.totalorder %s1412_s9, %s1123_s27  ;;  %s1128_s8 = scalar_lea.hbm %s1569_s1, 4096 }
  0x4d   : > { %p1125_p8 = pneg %p1585_p6  ;;  %p1129_p13 = scmp.lt.u32.totalorder %s1412_s9, %s1569_s1 }
  0x4e   : > { %p1130_p2 = scmp.lt.u32.totalorder %s1128_s8, %s1123_s27  ;;  %p1132_p11 = scmp.lt.u32.totalorder %s1123_s27, %s1412_s9 }
  0x4f   : > { %p1126_p10 = pnand %p1125_p8, %p1124_p3 }
  0x50   : > { %p1131_p7 = por %p1130_p2, %p1129_p13 }
  0x51   : > { %p1127_p12 = pneg %p1126_p10 }
  0x52   : > { %p1133_p1 = por %p1132_p11, %p1131_p7 }
  0x54   : > { %p1134_p4 = pnand %p1133_p1, %p1127_p12 }
  0x56   : > { %1137 = shalt.err (!%p1134_p4)
}
  0x57   : > { %s1138_s25 = scalar_lea.vmem %s1416_s19, 2048  ;;  %s1249_s4 = smov [#allocation5]  }
  0x58   : > { %p1139_p0 = scmp.ne.s32.totalorder %s1416_s19, %s1138_s25  ;;  %s1143_s26 = sshll.u32 %s1249_s4, 4  ;;  %s1144_s26 = int_to_ptr.vmem [resolvable:$false] %s1143_s26 }
  0x59   : > { %s1145_s5 = scalar_lea.vmem %s1144_s26, 4096  ;;  %p1146_p3 = scmp.lt.s32.totalorder %s1416_s19, %s1144_s26 }
  0x5a   : > { %p1141_p9 = pnand %p1139_p0, %p1125_p8  ;;  %p1147_p10 = scmp.lt.s32.totalorder %s1145_s5, %s1138_s25 }
  0x5c   : > { %p1142_p5 = pneg %p1141_p9  ;;  %p1148_p13 = por %p1147_p10, %p1146_p3 }
  0x5e   : > { %p1149_p2 = pnand %p1148_p13, %p1142_p5 }
  0x60   : > { %1152 = shalt.err (!%p1149_p2)
}
  0x61   : > { %s1586_s27 = smov 128   ;;  %p1587_p8 = scmp.ne.s32.totalorder %s1582_s24, 0 }
  0x62   : > { %1002 = dma.hbm_to_vmem [thread:$0]  (!%p1585_p6), %s1412_s9, 2048, %s1416_s19, %s1421_s10, %s1586_s27, %s1586_s27, %s1247_s11  }
  0x63   : > { %203 = sbr.rel (%p1587_p8) target bundleno = 620 (0x26c), region = 32  ;;  %p1588_p12 = scmp.eq.s32.totalorder (!%p1587_p8), %s1304_s18, 0 }
  0x6a   : > { %1206 = dma.done.wait (%p1588_p12), [#allocation3], 2048   ;;  %p1589_p7 = pmov %p1588_p12 }
  0x6b   : > { %s209_s28 = sand.u32 1, %s1304_s18   ;;  %s211_s7 = sand.u32 1, %s1227_s13  }
  0x6c   : > { %1208 = vsyncadd (%p1589_p7), [#allocation3], 4294965248  ;;  %s1462_s8 = sshll.u32 %s211_s7, 7  ;;  %s210_s10 = scalar_lea.sflag [#allocation6], %s209_s28 }
  0x6d   : > { %s1465_s11 = scalar_lea.vmem [#allocation5], %s1462_s8  ;;  %p1590_p6 = scmp.ne.s32.totalorder %s1579_s21, 0 }
  0x6f   : > { %1210 = dma.done.wait (%p1590_p6), %s210_s10, 2048  }
  0x70   : > { %1212 = vsyncadd (%p1590_p6), %s210_s10, 4294965248  ;;  %p1591_p11 = pmov %p1589_p7 }
  0x71   : > { %p1592_p1 = pmov %p1589_p7 }
  0x72   : > { %1214 = dma.done.wait (%p1591_p11), [#allocation6], 2048  }
  0x73   : > { %1216 = vsyncadd (%p1592_p1), [#allocation6], 4294965248  ;;  %v242_v0 = vld [vmem:[%s1465_s11] sm:$0xff]  ;;  %v243_v1 = vld [vmem:[%s1465_s11 + $0x8] sm:$0xff]  ;;  %s1492_s18 = scalar_lea.vmem [#allocation8], %s1462_s8  ;;  %s739_s21 = sshll.u32 %s1235_s15, 11 }
  0x74   : > { %v244_v2 = vld [vmem:[%s1465_s11 + $0x10] sm:$0xff]  ;;  %v916_v3 = vpack.c.bf16 %v243_v1, %v242_v0  ;;  %v245_v4 = vld [vmem:[%s1465_s11 + $0x18] sm:$0xff]  ;;  %v246_v6 = vld [vmem:[%s1465_s11 + $0x20] sm:$0xff]  ;;  %s612_s24 = sshll.u32 %s1492_s18, 4  ;;  %s1513_s6 = scalar_lea.hbm %s1571_s3, %s739_s21  ;;  %s1515_s24 = int_to_ptr.vmem [resolvable:$true] %s612_s24 }
  0x75   : > { %v920_v5 = vpack.c.bf16 %v245_v4, %v244_v2  ;;  %v247_v7 = vld [vmem:[%s1465_s11 + $0x28] sm:$0xff]  ;;  %v258_v9 = vld [vmem:[#allocation2] sm:$0xff]  ;;  %v248_v10 = vld [vmem:[%s1465_s11 + $0x30] sm:$0xff]  ;;  %s1521_s15 = scalar_lea.sflag [#allocation4], %s211_s7  ;;  %s1153_s29 = scalar_lea.vmem %s1515_s24, 2048 }
  0x76   : > { %917 = vmatprep.subr.bf16.mxu0 %v916_v3  ;;  %v924_v8 = vpack.c.bf16 %v247_v7, %v246_v6  ;;  %v249_v11 = vld [vmem:[%s1465_s11 + $0x38] sm:$0xff]  ;;  %836 = vmatprep.mubr.f32.mxu0 %v258_v9  ;;  %v250_v13 = vld [vmem:[%s1465_s11 + $0x40] sm:$0xff]  ;;  %v251_v14 = vld [vmem:[%s1465_s11 + $0x48] sm:$0xff]  ;;  %p1154_p4 = scmp.ne.s32.totalorder %s1515_s24, %s1153_s29  ;;  %p1593_p0 = scmp.ne.s32.totalorder %s1580_s22, 0 }
  0x77   : > { %919 = vmatpush3.bf16.msra.mxu0 %v916_v3  ;;  %v928_v12 = vpack.c.bf16 %v249_v11, %v248_v10  ;;  %v419_v15 = vld [vmem:[#allocation7] sm:$0xff]  ;;  %v420_v16 = vld [vmem:[#allocation7 + $0x8] sm:$0xff]  ;;  %v421_v17 = vld [vmem:[#allocation7 + $0x10] sm:$0xff]  ;;  %v932_v21 = vpack.c.bf16 %v251_v14, %v250_v13  ;;  %s1250_s25 = smov [#allocation8]  }
  0x78   : > { %921 = vmatprep.subr.bf16.mxu0 %v920_v5  ;;  %v422_v18 = vld [vmem:[#allocation7 + $0x18] sm:$0xff]  ;;  %v948_v19 = vpack.c.bf16 %v420_v16, %v419_v15  ;;  %v423_v22 = vld [vmem:[#allocation7 + $0x20] sm:$0xff]  ;;  %v424_v23 = vld [vmem:[#allocation7 + $0x28] sm:$0xff]  ;;  %p1155_p9 = pnand %p1154_p4, %p1593_p0  ;;  %s1157_s4 = sshll.u32 %s1250_s25, 4  ;;  %s1158_s4 = int_to_ptr.vmem [resolvable:$false] %s1157_s4 }
  0x79   : > { %v952_v20 = vpack.c.bf16 %v422_v18, %v421_v17  ;;  %v252_v24 = vld [vmem:[%s1465_s11 + $0x50] sm:$0xff]  ;;  %v253_v25 = vld [vmem:[%s1465_s11 + $0x58] sm:$0xff]  ;;  %v956_v26 = vpack.c.bf16 %v424_v23, %v423_v22  ;;  %v254_v30 = vld [vmem:[%s1465_s11 + $0x60] sm:$0xff]  ;;  %s1159_s26 = scalar_lea.vmem %s1158_s4, 4096  ;;  %p1160_p3 = scmp.lt.s32.totalorder %s1515_s24, %s1158_s4 }
  0x7a   : > { %949 = vmatprep.subr.bf16.mxu1 %v948_v19  ;;  %v936_v27 = vpack.c.bf16 %v253_v25, %v252_v24  ;;  %v425_v28 = vld [vmem:[#allocation7 + $0x30] sm:$0xff]  ;;  %v426_v29 = vld [vmem:[#allocation7 + $0x38] sm:$0xff]  ;;  %v255_v31 = vld [vmem:[%s1465_s11 + $0x68] sm:$0xff]  ;;  %p1156_p5 = pneg %p1155_p9  ;;  %p1161_p10 = scmp.lt.s32.totalorder %s1159_s26, %s1153_s29 }
  0x7b   : > { %923 = vmatpush3.bf16.msra.mxu0 %v920_v5  ;;  %951 = vmatpush3.bf16.msra.mxu1 %v948_v19  ;;  %v960_v32 = vpack.c.bf16 %v426_v29, %v425_v28  ;;  %v940_v33 = vpack.c.bf16 %v255_v31, %v254_v30  ;;  %v427_v34 = vld [vmem:[#allocation7 + $0x40] sm:$0xff]  ;;  %v428_v35 = vld [vmem:[#allocation7 + $0x48] sm:$0xff]  ;;  %v256_v36 = vld [vmem:[%s1465_s11 + $0x70] sm:$0xff] }
  0x7c   : > { %925 = vmatprep.subr.bf16.mxu0 %v924_v8  ;;  %953 = vmatprep.subr.bf16.mxu1 %v952_v20  ;;  %v257_v37 = vld [vmem:[%s1465_s11 + $0x78] sm:$0xff]  ;;  %v964_v38 = vpack.c.bf16 %v428_v35, %v427_v34  ;;  %v429_v40 = vld [vmem:[#allocation7 + $0x50] sm:$0xff]  ;;  %v431_v43 = vld [vmem:[#allocation7 + $0x60] sm:$0xff]  ;;  %p1162_p13 = por %p1161_p10, %p1160_p3 }
  0x7d   : > { %v944_v39 = vpack.c.bf16 %v257_v37, %v256_v36  ;;  %v430_v41 = vld [vmem:[#allocation7 + $0x58] sm:$0xff]  ;;  %v432_v44 = vld [vmem:[#allocation7 + $0x68] sm:$0xff]  ;;  %v260_v47 = vld [vmem:[#allocation2 + $0x10] sm:$0xff] }
  0x7e   : > { %v968_v42 = vpack.c.bf16 %v430_v41, %v429_v40  ;;  %v259_v45 = vld [vmem:[#allocation2 + $0x8] sm:$0xff]  ;;  %v972_v46 = vpack.c.bf16 %v432_v44, %v431_v43  ;;  %v433_v48 = vld [vmem:[#allocation7 + $0x70] sm:$0xff]  ;;  %v434_v49 = vld [vmem:[#allocation7 + $0x78] sm:$0xff]  ;;  %p1163_p2 = pnand %p1162_p13, %p1156_p5 }
  0x7f   : > { %927 = vmatpush3.bf16.msra.mxu0 %v924_v8  ;;  %955 = vmatpush3.bf16.msra.mxu1 %v952_v20  ;;  %v261_v50 = vld [vmem:[#allocation2 + $0x18] sm:$0xff]  ;;  %v976_v51 = vpack.c.bf16 %v434_v49, %v433_v48  ;;  %v262_v52 = vld [vmem:[#allocation2 + $0x20] sm:$0xff]  ;;  %v263_v53 = vld [vmem:[#allocation2 + $0x28] sm:$0xff] }
  0x80   : > { %929 = vmatprep.subr.bf16.mxu0 %v928_v12  ;;  %957 = vmatprep.subr.bf16.mxu1 %v956_v26  ;;  %v264_v54 = vld [vmem:[#allocation2 + $0x30] sm:$0xff]  ;;  %v265_v55 = vld [vmem:[#allocation2 + $0x38] sm:$0xff]  ;;  %v266_v56 = vld [vmem:[#allocation2 + $0x40] sm:$0xff] }
  0x81   : > { %v267_v57 = vld [vmem:[#allocation2 + $0x48] sm:$0xff]  ;;  %v268_v58 = vld [vmem:[#allocation2 + $0x50] sm:$0xff]  ;;  %v269_v59 = vld [vmem:[#allocation2 + $0x58] sm:$0xff] }
  0x82   : > { %v270_v60 = vld [vmem:[#allocation2 + $0x60] sm:$0xff]  ;;  %v271_v61 = vld [vmem:[#allocation2 + $0x68] sm:$0xff]  ;;  %v272_v62 = vld [vmem:[#allocation2 + $0x70] sm:$0xff] }
  0x83   : > { %931 = vmatpush3.bf16.msra.mxu0 %v928_v12  ;;  %959 = vmatpush3.bf16.msra.mxu1 %v956_v26  ;;  %v273_v63 = vld [vmem:[#allocation2 + $0x78] sm:$0xff] }
  0x84   : > { %933 = vmatprep.subr.bf16.mxu0 %v932_v21  ;;  %961 = vmatprep.subr.bf16.mxu1 %v960_v32 }
  0x87   : > { %935 = vmatpush3.bf16.msra.mxu0 %v932_v21  ;;  %963 = vmatpush3.bf16.msra.mxu1 %v960_v32 }
  0x88   : > { %937 = vmatprep.subr.bf16.mxu0 %v936_v27  ;;  %965 = vmatprep.subr.bf16.mxu1 %v964_v38 }
  0x8b   : > { %939 = vmatpush3.bf16.msra.mxu0 %v936_v27  ;;  %967 = vmatpush3.bf16.msra.mxu1 %v964_v38 }
  0x8c   : > { %941 = vmatprep.subr.bf16.mxu0 %v940_v33  ;;  %969 = vmatprep.subr.bf16.mxu1 %v968_v42 }
  0x8f   : > { %943 = vmatpush3.bf16.msra.mxu0 %v940_v33  ;;  %971 = vmatpush3.bf16.msra.mxu1 %v968_v42 }
  0x90   : > { %945 = vmatprep.subr.bf16.mxu0 %v944_v39  ;;  %973 = vmatprep.subr.bf16.mxu1 %v972_v46 }
  0x93   : > { %947 = vmatpush3.bf16.msra.mxu0 %v944_v39  ;;  %975 = vmatpush3.bf16.msra.mxu1 %v972_v46 }
  0x94   : > { %977 = vmatprep.subr.bf16.mxu1 %v976_v51 }
  0x96   : > { %837 = vmatmul.mubr.f32.vlgmr.msra.gmra.mrb[0].mxu0 %v259_v45 }
  0x97   : > { %839 = vmatprep.mubr.f32.mxu0 %v260_v47  ;;  %979 = vmatpush3.bf16.msra.mxu1 %v976_v51 }
  0x9a   : > { %840 = vmatmul.mubr.f32.gmra.mrb[2].mxu0 %v261_v50 }
  0x9b   : > { %842 = vmatprep.mubr.f32.mxu0 %v262_v52 }
  0x9e   : > { %843 = vmatmul.mubr.f32.gmra.mrb[4].mxu0 %v263_v53 }
  0x9f   : > { %845 = vmatprep.mubr.f32.mxu0 %v264_v54 }
  0xa2   : > { %846 = vmatmul.mubr.f32.gmra.mrb[6].mxu0 %v265_v55 }
  0xa3   : > { %848 = vmatprep.mubr.f32.mxu0 %v266_v56 }
  0xa6   : > { %849 = vmatmul.mubr.f32.gmra.mrb[8].mxu0 %v267_v57 }
  0xa7   : > { %851 = vmatprep.mubr.f32.mxu0 %v268_v58 }
  0xaa   : > { %852 = vmatmul.mubr.f32.gmra.mrb[10].mxu0 %v269_v59 }
  0xab   : > { %854 = vmatprep.mubr.f32.mxu0 %v270_v60 }
  0xae   : > { %855 = vmatmul.mubr.f32.gmra.mrb[12].mxu0 %v271_v61 }
  0xaf   : > { %857 = vmatprep.mubr.f32.mxu0 %v272_v62 }
  0xb2   : > { %858 = vmatmul.mubr.f32.gmra.mrb[14].mxu0 %v273_v63 }
 0x169   : > { %v838_v0 = vpop.f32.mrb[0].mxu0 }
 0x16a   : > { %v340_v1 = vpop.f32.mrb[1].mxu0 }
 0x16b   : > { %892 = vmatprep.mubr.f32.mxu1 %v340_v1 }
 0x16c   : > { %893 = vmatmul.mubr.f32.vlgmr.msra.gmra.mrb[0].mxu1 %v838_v0 }
 0x16d   : > { %v841_v2 = vpop.f32.mrb[2].mxu0 }
 0x16e   : > { %v350_v3 = vpop.f32.mrb[3].mxu0 }
 0x16f   : > { %895 = vmatprep.mubr.f32.mxu1 %v350_v3 }
 0x170   : > { %896 = vmatmul.mubr.f32.gmra.mrb[2].mxu1 %v841_v2 }
 0x171   : > { %v844_v4 = vpop.f32.mrb[4].mxu0 }
 0x172   : > { %v360_v5 = vpop.f32.mrb[5].mxu0 }
 0x173   : > { %898 = vmatprep.mubr.f32.mxu1 %v360_v5 }
 0x174   : > { %899 = vmatmul.mubr.f32.gmra.mrb[4].mxu1 %v844_v4 }
 0x175   : > { %v847_v6 = vpop.f32.mrb[6].mxu0 }
 0x176   : > { %v370_v7 = vpop.f32.mrb[7].mxu0 }
 0x177   : > { %901 = vmatprep.mubr.f32.mxu1 %v370_v7 }
 0x178   : > { %902 = vmatmul.mubr.f32.gmra.mrb[6].mxu1 %v847_v6 }
 0x179   : > { %v850_v8 = vpop.f32.mrb[8].mxu0 }
 0x17a   : > { %v380_v9 = vpop.f32.mrb[9].mxu0 }
 0x17b   : > { %904 = vmatprep.mubr.f32.mxu1 %v380_v9 }
 0x17c   : > { %905 = vmatmul.mubr.f32.gmra.mrb[8].mxu1 %v850_v8 }
 0x17d   : > { %v853_v10 = vpop.f32.mrb[10].mxu0 }
 0x17e   : > { %v390_v11 = vpop.f32.mrb[11].mxu0 }
 0x17f   : > { %907 = vmatprep.mubr.f32.mxu1 %v390_v11 }
 0x180   : > { %908 = vmatmul.mubr.f32.gmra.mrb[10].mxu1 %v853_v10 }
 0x181   : > { %v856_v12 = vpop.f32.mrb[12].mxu0 }
 0x182   : > { %v400_v13 = vpop.f32.mrb[13].mxu0 }
 0x183   : > { %910 = vmatprep.mubr.f32.mxu1 %v400_v13 }
 0x184   : > { %911 = vmatmul.mubr.f32.gmra.mrb[12].mxu1 %v856_v12 }
 0x185   : > { %v859_v14 = vpop.f32.mrb[14].mxu0 }
 0x186   : > { %v410_v15 = vpop.f32.mrb[15].mxu0 }
 0x187   : > { %913 = vmatprep.mubr.f32.mxu1 %v410_v15 }
 0x188   : > { %914 = vmatmul.mubr.f32.gmra.mrb[14].mxu1 %v859_v14 }
 0x23f   : > { %v894_v16 = vpop.f32.mrb[0].mxu1 }
 0x240   : > { %581 = vst [vmem:[%s1492_s18 + $0x8] sm:$0xff] %v894_v16  ;;  %v501_v17 = vpop.f32.mrb[1].mxu1 }
 0x241   : > { %580 = vst [vmem:[%s1492_s18] sm:$0xff] %v501_v17 }
 0x243   : > { %v897_v18 = vpop.f32.mrb[2].mxu1 }
 0x244   : > { %583 = vst [vmem:[%s1492_s18 + $0x18] sm:$0xff] %v897_v18  ;;  %v511_v19 = vpop.f32.mrb[3].mxu1 }
 0x245   : > { %582 = vst [vmem:[%s1492_s18 + $0x10] sm:$0xff] %v511_v19 }
 0x247   : > { %v900_v20 = vpop.f32.mrb[4].mxu1 }
 0x248   : > { %585 = vst [vmem:[%s1492_s18 + $0x28] sm:$0xff] %v900_v20  ;;  %v521_v21 = vpop.f32.mrb[5].mxu1 }
 0x249   : > { %584 = vst [vmem:[%s1492_s18 + $0x20] sm:$0xff] %v521_v21 }
 0x24b   : > { %v903_v22 = vpop.f32.mrb[6].mxu1 }
 0x24c   : > { %587 = vst [vmem:[%s1492_s18 + $0x38] sm:$0xff] %v903_v22  ;;  %v531_v23 = vpop.f32.mrb[7].mxu1 }
 0x24d   : > { %586 = vst [vmem:[%s1492_s18 + $0x30] sm:$0xff] %v531_v23 }
 0x24f   : > { %v906_v24 = vpop.f32.mrb[8].mxu1 }
 0x250   : > { %589 = vst [vmem:[%s1492_s18 + $0x48] sm:$0xff] %v906_v24  ;;  %v541_v25 = vpop.f32.mrb[9].mxu1 }
 0x251   : > { %588 = vst [vmem:[%s1492_s18 + $0x40] sm:$0xff] %v541_v25 }
 0x253   : > { %v909_v26 = vpop.f32.mrb[10].mxu1 }
 0x254   : > { %591 = vst [vmem:[%s1492_s18 + $0x58] sm:$0xff] %v909_v26  ;;  %v551_v27 = vpop.f32.mrb[11].mxu1 }
 0x255   : > { %590 = vst [vmem:[%s1492_s18 + $0x50] sm:$0xff] %v551_v27 }
 0x257   : > { %v912_v28 = vpop.f32.mrb[12].mxu1 }
 0x258   : > { %593 = vst [vmem:[%s1492_s18 + $0x68] sm:$0xff] %v912_v28  ;;  %v561_v29 = vpop.f32.mrb[13].mxu1 }
 0x259   : > { %592 = vst [vmem:[%s1492_s18 + $0x60] sm:$0xff] %v561_v29 }
 0x25b   : > { %v915_v30 = vpop.f32.mrb[14].mxu1 }
 0x25c   : > { %595 = vst [vmem:[%s1492_s18 + $0x78] sm:$0xff] %v915_v30  ;;  %v571_v31 = vpop.f32.mrb[15].mxu1 }
 0x25d   : > { %594 = vst [vmem:[%s1492_s18 + $0x70] sm:$0xff] %v571_v31 }
 0x25e   : > { %1166 = shalt.err (!%p1163_p2)
}
 0x25f   : > { %s1167_s5 = scalar_lea.hbm %s1513_s6, 2048  ;;  %s1171_s7 = scalar_lea.hbm %s1571_s3, 4096 }
 0x260   : > { %p1168_p8 = scmp.ne.s32.totalorder %s1513_s6, %s1167_s5  ;;  %p1172_p6 = scmp.lt.u32.totalorder %s1513_s6, %s1571_s3 }
 0x261   : > { %p1173_p11 = scmp.lt.u32.totalorder %s1171_s7, %s1167_s5  ;;  %p1175_p4 = scmp.lt.u32.totalorder %s1167_s5, %s1513_s6 }
 0x262   : > { %p1169_p12 = pnand %p1168_p8, %p1593_p0 }
 0x263   : > { %p1174_p1 = por %p1173_p11, %p1172_p6 }
 0x264   : > { %p1170_p7 = pneg %p1169_p12 }
 0x265   : > { %p1176_p9 = por %p1175_p4, %p1174_p1 }
 0x267   : > { %p1177_p5 = pnand %p1176_p9, %p1170_p7 }
 0x269   : > { %1180 = shalt.err (!%p1177_p5)
}
 0x26a   : > { %s1251_s11 = smov 128   ;;  %s1252_s18 = smov 8  }
 0x26b   : > { %990 = dma.vmem_to_hbm [thread:$0]  (%p1593_p0), %s1515_s24, 2048, %s1513_s6, %s1521_s15, %s1251_s11, %s1251_s11, %s1252_s18  }
 0x26c PF: > { %s627_s21 = sand.u32 1, %s1223_s12   ;;  %p1594_p3 = scmp.ne.s32.totalorder %s1581_s23, 0 }
 0x26d   : > { %p1595_p10 = scmp.ge.s32.totalorder %s1243_s17, 2  ;;  %s628_s9 = scalar_lea.sflag [#allocation4], %s627_s21 }
 0x26f   : > { %p1004_p13 = pnand %p1595_p10, %p1594_p3 }
 0x271   : > { %1218 = dma.done.wait (!%p1004_p13), %s628_s9, 2048  }
 0x272   : > { %1220 = vsyncadd (!%p1004_p13), %s628_s9, 4294965248  ;;  %s20_s17 = sadd.s32 1, %s1243_s17   ;;  %s1596_s12 = smov %s1227_s13 }
 0x273   : > { %p17_p2 = scmp.ge.s32.totalorder %s20_s17, 4   ;;  %s1597_s13 = smov %s1231_s14 }
 0x274   : > { %s1598_s14 = smov %s1419_s20  ;;  %s1599_s15 = smov %s1239_s16 }
 0x275   : > { %s1600_s16 = smov %s1602_s30  ;;  %19 = sbr.rel (!%p17_p2) target bundleno = 7 (0x7), region = 87 }
 0x27c   :  { %633 = vsyncpa [#allocation3], 1 }
 0x27d   :  { %635 = vsyncpa [#allocation3 + $0x1], 1 }
 0x27e   :  { %636 = vsyncpa [#allocation6], 1 }
 0x27f   :  { %638 = vsyncpa [#allocation6 + $0x1], 1 }
 0x280   :  { %639 = vsyncpa [#allocation4], 1 }
 0x281   :  { %641 = vsyncpa [#allocation4 + $0x1], 1 }

</bundles_post_ra>
